<compile_context>
chip_gen: v5e
topology: v5e:2x2
jax: 0.10.0
libtpu: 0.0.40
codegen_flags: <defaults>
</compile_context>

<pallas_src>
import functools

import jax
import jax.numpy as jnp
from jax import lax
from jax.experimental import pallas as pl
from jax.experimental.pallas import tpu as pltpu

EPS = 1e-5  # PyTorch BatchNorm1d default


def nba_mlp_kernel(n_ref, inv_n_ref, x_ref, w1_ref, bn1_ref, w2_ref, bn2_ref,
                   w3_ref, b3_ref, o_ref):
    """Whole-batch fused MLP: fc1 -> bn1 -> relu -> fc2 -> bn2 -> relu -> fc3.

    n_ref:     (1,) int32 SMEM   true (unpadded) row count
    inv_n_ref: (1,) f32   SMEM   1 / n
    x_ref:     (B_pad, IN_PAD)   bf16, padded rows/cols are zero
    w*_ref:    bf16 weights, (in, out) layout (pre-padded)
    bn*_ref:   (2, C) f32, row 0 = gamma, row 1 = beta
    b3_ref:    (1, OUT_PAD) f32
    o_ref:     (B_pad, OUT_PAD) f32
    """
    n = n_ref[0]
    inv_n = inv_n_ref[0]
    b_pad = x_ref.shape[0]

    def bn_relu(z, bn_ref):
        # Training-mode BN over the full batch.  Padded rows of z are exactly
        # zero, so plain column sums are the exact full-batch sums; divide by
        # the true row count.
        mean = jnp.sum(z, axis=0, keepdims=True) * inv_n
        # Clamp: one-pass E[z^2] - mean^2 can go slightly negative in f32.
        var = jnp.maximum(
            jnp.sum(z * z, axis=0, keepdims=True) * inv_n - mean * mean, 0.0)
        scale = bn_ref[0:1, :] * lax.rsqrt(var + EPS)   # gamma * inv_std (EUP)
        shift = bn_ref[1:2, :] - mean * scale           # beta - mean*scale
        return jnp.maximum(z * scale + shift, 0.0)

    # ---- fc1 (bias cancelled by bn1 mean subtraction) + bn1 + relu ----
    z1 = jnp.dot(x_ref[...], w1_ref[...], preferred_element_type=jnp.float32)
    h1 = bn_relu(z1, bn1_ref)

    # Keep padded rows exactly zero so layer-2 batch statistics stay exact.
    row_ids = lax.broadcasted_iota(jnp.int32, (b_pad, 1), 0)
    h1 = jnp.where(row_ids < n, h1, 0.0)

    # ---- fc2 (bias cancelled by bn2) + bn2 + relu ----
    z2 = jnp.dot(h1.astype(jnp.bfloat16), w2_ref[...],
                 preferred_element_type=jnp.float32)
    h2 = bn_relu(z2, bn2_ref)

    # ---- fc3 (real bias) ----
    y = jnp.dot(h2.astype(jnp.bfloat16), w3_ref[...],
                preferred_element_type=jnp.float32) + b3_ref[...]
    o_ref[...] = y


def prepare_params(params):
    """One-time weight preparation (cast / pad / concat), hoisted off the
    per-call path.  Returns (prepared pytree of device arrays, out_size)."""
    w1, w2, w3 = params["w1"], params["w2"], params["w3"]
    in_size = w1.shape[0]
    out_size = w3.shape[1]
    in_pad = ((in_size + 63) // 64) * 64              # 61 -> 64
    out_pad = ((out_size + 127) // 128) * 128         # 50 -> 128 (lane-dense)
    bf = jnp.bfloat16
    prep = {
        "w1": jnp.pad(w1.astype(bf), ((0, in_pad - in_size), (0, 0))),
        "w2": w2.astype(bf),
        "w3": jnp.pad(w3.astype(bf), ((0, 0), (0, out_pad - out_size))),
        "b3": jnp.pad(params["b3"].astype(jnp.float32),
                      ((0, 0), (0, out_pad - out_size))),
        "bn1": jnp.concatenate([params["g1"], params["bt1"]],
                               axis=0).astype(jnp.float32),   # (2, hidden)
        "bn2": jnp.concatenate([params["g2"], params["bt2"]],
                               axis=0).astype(jnp.float32),   # (2, hidden//2)
        # b1/b2 intentionally dropped: exactly cancelled by training-mode BN.
    }
    return prep, out_size


@functools.partial(jax.jit, static_argnames=("out_size",))
def nba_mlp_forward(x, prep, out_size):
    B, F = x.shape
    IN_PAD, H1 = prep["w1"].shape
    H2 = prep["w2"].shape[1]
    OUT_PAD = prep["w3"].shape[1]

    # bf16 MXU sublane tile is 16 -> pad the batch to a multiple of 16.
    B_pad = max(16, ((B + 15) // 16) * 16)

    # Only per-call prep left: pad/cast x (padded rows/cols exactly zero).
    x_p = jnp.pad(x.astype(jnp.bfloat16), ((0, B_pad - B), (0, IN_PAD - F)))
    n = jnp.array([B], jnp.int32)
    inv_n = jnp.array([1.0 / B], jnp.float32)

    # VMEM budget: weights + per-row live f32/bf16 activations, 2x headroom,
    # capped at the smallest physical VMEM across targets (v7x: 64 MiB).
    weight_bytes = (2 * (IN_PAD * H1 + H1 * H2 + H2 * OUT_PAD)
                    + 4 * (2 * H1 + 2 * H2 + OUT_PAD))
    row_bytes = 2 * IN_PAD + 6 * H1 + 6 * H2 + 4 * OUT_PAD
    vmem_limit = int(min(64 * 1024 * 1024,
                         max(16 * 1024 * 1024,
                             2 * (weight_bytes + B_pad * row_bytes))))

    flops = 2 * B_pad * (IN_PAD * H1 + H1 * H2 + H2 * OUT_PAD)
    bytes_accessed = (B_pad * IN_PAD * 2 + weight_bytes + B_pad * OUT_PAD * 4)

    smem = pl.BlockSpec(memory_space=pltpu.MemorySpace.SMEM)
    vmem = pl.BlockSpec(memory_space=pltpu.MemorySpace.VMEM)

    y_pad = pl.pallas_call(
        nba_mlp_kernel,
        out_shape=jax.ShapeDtypeStruct((B_pad, OUT_PAD), jnp.float32),
        in_specs=[smem, smem, vmem, vmem, vmem, vmem, vmem, vmem, vmem],
        out_specs=vmem,
        compiler_params=pltpu.CompilerParams(vmem_limit_bytes=vmem_limit),
        cost_estimate=pl.CostEstimate(flops=flops,
                                      transcendentals=H1 + H2,
                                      bytes_accessed=bytes_accessed),
    )(n, inv_n, x_p, prep["w1"], prep["bn1"], prep["w2"], prep["bn2"],
      prep["w3"], prep["b3"])
    return y_pad[:B, :out_size]


def init_params(key, input_size=61, hidden_size=512, output_size=50):
    ks = jax.random.split(key, 10)
    h2 = hidden_size // 2

    def lin(kw, kb, fan_in, fan_out):
        bound = fan_in ** -0.5
        w = jax.random.uniform(kw, (fan_in, fan_out), jnp.float32, -bound, bound)
        b = jax.random.uniform(kb, (1, fan_out), jnp.float32, -bound, bound)
        return w, b

    w1, b1 = lin(ks[0], ks[1], input_size, hidden_size)
    w2, b2 = lin(ks[2], ks[3], hidden_size, h2)
    w3, b3 = lin(ks[4], ks[5], h2, output_size)
    # Non-trivial gamma/beta so the self-check exercises the BN affine path
    # (PyTorch default init is gamma=1, beta=0).
    return {
        "w1": w1, "b1": b1,
        "g1": 1.0 + 0.1 * jax.random.normal(ks[6], (1, hidden_size), jnp.float32),
        "bt1": 0.1 * jax.random.normal(ks[7], (1, hidden_size), jnp.float32),
        "w2": w2, "b2": b2,
        "g2": 1.0 + 0.1 * jax.random.normal(ks[8], (1, h2), jnp.float32),
        "bt2": 0.1 * jax.random.normal(ks[9], (1, h2), jnp.float32),
        "w3": w3, "b3": b3,
    }


def reference_forward(x, p):
    """Module semantics (training-mode BN, biases included), with matmul
    operands at the same bf16 precision the kernel uses (f32 accumulation)."""
    def mm(a, w):
        return jnp.dot(a.astype(jnp.bfloat16), w.astype(jnp.bfloat16),
                       preferred_element_type=jnp.float32)

    def bn(h, g, b):
        m = jnp.mean(h, axis=0, keepdims=True)
        v = jnp.mean((h - m) ** 2, axis=0, keepdims=True)
        return (h - m) * lax.rsqrt(v + EPS) * g + b

    h = jnp.maximum(bn(mm(x, p["w1"]) + p["b1"], p["g1"], p["bt1"]), 0.0)
    h = jnp.maximum(bn(mm(h, p["w2"]) + p["b2"], p["g2"], p["bt2"]), 0.0)
    return mm(h, p["w3"]) + p["b3"]


if __name__ == "__main__":
    key = jax.random.PRNGKey(0)
    kx, kp = jax.random.split(key)

    B, INPUT, HIDDEN, OUT = 8, 61, 512, 50
    x = jax.random.normal(kx, (B, INPUT), jnp.float32)
    params = init_params(kp, INPUT, HIDDEN, OUT)

    # One-time weight prep (cast/pad/concat), off the per-call path.
    prep, out_size = prepare_params(params)
    prep = jax.block_until_ready(prep)

    y = nba_mlp_forward(x, prep, out_size)
    jax.block_until_ready(y)

    y_ref = reference_forward(x, params)
    assert y.shape == (B, OUT)
    max_err = float(jnp.max(jnp.abs(y - y_ref)))
    assert jnp.allclose(y, y_ref, atol=1e-2, rtol=1e-2), (
        f"mismatch vs reference, max abs err {max_err}")

    print("KERNEL_OK")
</pallas_src>

<mosaic_0001>
module attributes {stable_mosaic.version = 11 : i64} {
  func.func @nba_mlp_kernel(%arg0: memref<1xi32, #tpu.memory_space<smem>>, %arg1: memref<1xf32, #tpu.memory_space<smem>>, %arg2: memref<16x64xbf16, #tpu.memory_space<vmem>>, %arg3: memref<64x512xbf16, #tpu.memory_space<vmem>>, %arg4: memref<2x512xf32, #tpu.memory_space<vmem>>, %arg5: memref<512x256xbf16, #tpu.memory_space<vmem>>, %arg6: memref<2x256xf32, #tpu.memory_space<vmem>>, %arg7: memref<256x128xbf16, #tpu.memory_space<vmem>>, %arg8: memref<1x128xf32, #tpu.memory_space<vmem>>, %arg9: memref<16x128xf32, #tpu.memory_space<vmem>>) attributes {dimension_semantics = [], scalar_prefetch = 0 : i64, scratch_operands = 0 : i64, tpu.core_type = #tpu.core_type<tc>} {
    %c0 = arith.constant 0 : index
    %0 = memref.load %arg0[%c0] : memref<1xi32, #tpu.memory_space<smem>>
    %c0_0 = arith.constant 0 : index
    %1 = memref.load %arg1[%c0_0] : memref<1xf32, #tpu.memory_space<smem>>
    %c0_1 = arith.constant 0 : index
    %c0_2 = arith.constant 0 : index
    %2 = vector.load %arg2[%c0_1, %c0_2] : memref<16x64xbf16, #tpu.memory_space<vmem>>, vector<16x64xbf16>
    %c0_3 = arith.constant 0 : index
    %c0_4 = arith.constant 0 : index
    %3 = vector.load %arg3[%c0_3, %c0_4] : memref<64x512xbf16, #tpu.memory_space<vmem>>, vector<64x512xbf16>
    %cst = arith.constant dense<0.000000e+00> : vector<16x512xf32>
    %4 = tpu.matmul %2, %3, %cst {dimension_numbers = #tpu.dot_dimension_numbers<[1], [0], [0], [1], [0, 0, 1, 1], [], []>} : vector<16x64xbf16>, vector<64x512xbf16>, vector<16x512xf32> -> vector<16x512xf32>
    %cst_5 = arith.constant dense<0.000000e+00> : vector<512xf32>
    %5 = vector.multi_reduction <add>, %4, %cst_5 [0] : vector<16x512xf32> to vector<512xf32>
    %6 = vector.shape_cast %5 : vector<512xf32> to vector<1x512xf32>
    %7 = vector.broadcast %1 : f32 to vector<1x512xf32>
    %8 = arith.mulf %6, %7 : vector<1x512xf32>
    %9 = arith.mulf %4, %4 : vector<16x512xf32>
    %cst_6 = arith.constant dense<0.000000e+00> : vector<512xf32>
    %10 = vector.multi_reduction <add>, %9, %cst_6 [0] : vector<16x512xf32> to vector<512xf32>
    %11 = vector.shape_cast %10 : vector<512xf32> to vector<1x512xf32>
    %12 = vector.broadcast %1 : f32 to vector<1x512xf32>
    %13 = arith.mulf %11, %12 : vector<1x512xf32>
    %14 = arith.mulf %8, %8 : vector<1x512xf32>
    %15 = arith.subf %13, %14 : vector<1x512xf32>
    %cst_7 = arith.constant 0.000000e+00 : f32
    %16 = vector.broadcast %cst_7 : f32 to vector<1x512xf32>
    %17 = arith.maximumf %15, %16 : vector<1x512xf32>
    %c0_8 = arith.constant 0 : index
    %c0_9 = arith.constant 0 : index
    %18 = vector.load %arg4[%c0_8, %c0_9] : memref<2x512xf32, #tpu.memory_space<vmem>>, vector<1x512xf32>
    %cst_10 = arith.constant 9.99999974E-6 : f32
    %19 = vector.broadcast %cst_10 : f32 to vector<1x512xf32>
    %20 = arith.addf %17, %19 : vector<1x512xf32>
    %21 = math.rsqrt %20 : vector<1x512xf32>
    %22 = arith.mulf %18, %21 : vector<1x512xf32>
    %c1 = arith.constant 1 : index
    %c0_11 = arith.constant 0 : index
    %23 = vector.load %arg4[%c1, %c0_11] : memref<2x512xf32, #tpu.memory_space<vmem>>, vector<1x512xf32>
    %24 = arith.mulf %8, %22 : vector<1x512xf32>
    %25 = arith.subf %23, %24 : vector<1x512xf32>
    %26 = vector.broadcast %22 : vector<1x512xf32> to vector<16x512xf32>
    %27 = arith.mulf %4, %26 : vector<16x512xf32>
    %28 = vector.broadcast %25 : vector<1x512xf32> to vector<16x512xf32>
    %29 = arith.addf %27, %28 : vector<16x512xf32>
    %cst_12 = arith.constant 0.000000e+00 : f32
    %30 = vector.broadcast %cst_12 : f32 to vector<16x512xf32>
    %31 = arith.maximumf %29, %30 : vector<16x512xf32>
    %32 = tpu.iota {dimensions = array<i32: 0>} : vector<16x1xi32>
    %33 = vector.broadcast %0 : i32 to vector<16x1xi32>
    %34 = arith.cmpi slt, %32, %33 : vector<16x1xi32>
    %cst_13 = arith.constant 0.000000e+00 : f32
    %35 = vector.shape_cast %34 : vector<16x1xi1> to vector<16x1xi1>
    %36 = vector.broadcast %35 : vector<16x1xi1> to vector<16x512xi1>
    %37 = vector.broadcast %cst_13 : f32 to vector<16x512xf32>
    %38 = arith.select %36, %31, %37 : vector<16x512xi1>, vector<16x512xf32>
    %39 = arith.truncf %38 : vector<16x512xf32> to vector<16x512xbf16>
    %c0_14 = arith.constant 0 : index
    %c0_15 = arith.constant 0 : index
    %40 = vector.load %arg5[%c0_14, %c0_15] : memref<512x256xbf16, #tpu.memory_space<vmem>>, vector<512x256xbf16>
    %cst_16 = arith.constant dense<0.000000e+00> : vector<16x256xf32>
    %41 = tpu.matmul %39, %40, %cst_16 {dimension_numbers = #tpu.dot_dimension_numbers<[1], [0], [0], [1], [0, 0, 1, 1], [], []>} : vector<16x512xbf16>, vector<512x256xbf16>, vector<16x256xf32> -> vector<16x256xf32>
    %cst_17 = arith.constant dense<0.000000e+00> : vector<256xf32>
    %42 = vector.multi_reduction <add>, %41, %cst_17 [0] : vector<16x256xf32> to vector<256xf32>
    %43 = vector.shape_cast %42 : vector<256xf32> to vector<1x256xf32>
    %44 = vector.broadcast %1 : f32 to vector<1x256xf32>
    %45 = arith.mulf %43, %44 : vector<1x256xf32>
    %46 = arith.mulf %41, %41 : vector<16x256xf32>
    %cst_18 = arith.constant dense<0.000000e+00> : vector<256xf32>
    %47 = vector.multi_reduction <add>, %46, %cst_18 [0] : vector<16x256xf32> to vector<256xf32>
    %48 = vector.shape_cast %47 : vector<256xf32> to vector<1x256xf32>
    %49 = vector.broadcast %1 : f32 to vector<1x256xf32>
    %50 = arith.mulf %48, %49 : vector<1x256xf32>
    %51 = arith.mulf %45, %45 : vector<1x256xf32>
    %52 = arith.subf %50, %51 : vector<1x256xf32>
    %cst_19 = arith.constant 0.000000e+00 : f32
    %53 = vector.broadcast %cst_19 : f32 to vector<1x256xf32>
    %54 = arith.maximumf %52, %53 : vector<1x256xf32>
    %c0_20 = arith.constant 0 : index
    %c0_21 = arith.constant 0 : index
    %55 = vector.load %arg6[%c0_20, %c0_21] : memref<2x256xf32, #tpu.memory_space<vmem>>, vector<1x256xf32>
    %cst_22 = arith.constant 9.99999974E-6 : f32
    %56 = vector.broadcast %cst_22 : f32 to vector<1x256xf32>
    %57 = arith.addf %54, %56 : vector<1x256xf32>
    %58 = math.rsqrt %57 : vector<1x256xf32>
    %59 = arith.mulf %55, %58 : vector<1x256xf32>
    %c1_23 = arith.constant 1 : index
    %c0_24 = arith.constant 0 : index
    %60 = vector.load %arg6[%c1_23, %c0_24] : memref<2x256xf32, #tpu.memory_space<vmem>>, vector<1x256xf32>
    %61 = arith.mulf %45, %59 : vector<1x256xf32>
    %62 = arith.subf %60, %61 : vector<1x256xf32>
    %63 = vector.broadcast %59 : vector<1x256xf32> to vector<16x256xf32>
    %64 = arith.mulf %41, %63 : vector<16x256xf32>
    %65 = vector.broadcast %62 : vector<1x256xf32> to vector<16x256xf32>
    %66 = arith.addf %64, %65 : vector<16x256xf32>
    %cst_25 = arith.constant 0.000000e+00 : f32
    %67 = vector.broadcast %cst_25 : f32 to vector<16x256xf32>
    %68 = arith.maximumf %66, %67 : vector<16x256xf32>
    %69 = arith.truncf %68 : vector<16x256xf32> to vector<16x256xbf16>
    %c0_26 = arith.constant 0 : index
    %c0_27 = arith.constant 0 : index
    %70 = vector.load %arg7[%c0_26, %c0_27] : memref<256x128xbf16, #tpu.memory_space<vmem>>, vector<256x128xbf16>
    %cst_28 = arith.constant dense<0.000000e+00> : vector<16x128xf32>
    %71 = tpu.matmul %69, %70, %cst_28 {dimension_numbers = #tpu.dot_dimension_numbers<[1], [0], [0], [1], [0, 0, 1, 1], [], []>} : vector<16x256xbf16>, vector<256x128xbf16>, vector<16x128xf32> -> vector<16x128xf32>
    %c0_29 = arith.constant 0 : index
    %c0_30 = arith.constant 0 : index
    %72 = vector.load %arg8[%c0_29, %c0_30] : memref<1x128xf32, #tpu.memory_space<vmem>>, vector<1x128xf32>
    %73 = vector.broadcast %72 : vector<1x128xf32> to vector<16x128xf32>
    %74 = arith.addf %71, %73 : vector<16x128xf32>
    %c0_31 = arith.constant 0 : index
    %c0_32 = arith.constant 0 : index
    %75 = vector.load %arg9[%c0_31, %c0_32] : memref<16x128xf32, #tpu.memory_space<vmem>>, vector<16x128xf32>
    tpu.vector_store %arg9[%c0_31, %c0_32], %74 {strides = array<i32>} : memref<16x128xf32, #tpu.memory_space<vmem>>, vector<16x128xf32>,
    return
  }
}

</mosaic_0001>

<bundles_post_ra>
// kernel: nba_mlp_forward.1
= control target key start
LH: loop header
LB: loop body
LE: loop exit
PB: predicated region body
PF: predicated region fallthrough
CT: control target
= control target key end

     0   :  { %16 = vsyncpa [#allocation5], 0  ;;  %s2192_s0 = inlined_call_operand.<no memory space> [shape: s32[1], index: 0, kind: input, shape index: {}]   ;;  %s2193_s1 = inlined_call_operand.<no memory space> [shape: f32[1], index: 1, kind: input, shape index: {}]   ;;  %s2194_s2 = inlined_call_operand.vmem [shape: bf16[16,64], index: 2, kind: input, shape index: {}]   ;;  %s2195_s3 = inlined_call_operand.hbm [shape: bf16[64,512], index: 3, kind: input, shape index: {}]   ;;  %s2196_s4 = inlined_call_operand.vmem [shape: f32[2,512], index: 4, kind: input, shape index: {}]   ;;  %s2197_s5 = inlined_call_operand.hbm [shape: bf16[512,256], index: 5, kind: input, shape index: {}]   ;;  %s2198_s6 = inlined_call_operand.vmem [shape: f32[2,256], index: 6, kind: input, shape index: {}]   ;;  %s2199_s7 = inlined_call_operand.hbm [shape: bf16[256,128], index: 7, kind: input, shape index: {}]   ;;  %s2200_s8 = inlined_call_operand.vmem [shape: f32[1,128], index: 8, kind: input, shape index: {}]   ;;  %s2201_s9 = inlined_call_operand.vmem [shape: f32[16,128], index: 9, kind: output, shape index: {}]  }
   0x1   :  { %17 = vsyncpa [#allocation7], 0  ;;  %s43_s11 = sshll.u32 %s2197_s5, 4  ;;  %s1856_s12 = smov [#allocation6]   ;;  %s44_s11 = int_to_ptr.hbm [resolvable:$true] %s43_s11 }
   0x2   :  { %s45_s13 = sshll.u32 %s1856_s12, 4  ;;  %s28_s16 = sshll.u32 %s2195_s3, 4  ;;  %s46_s13 = int_to_ptr.vmem [resolvable:$true] %s45_s13  ;;  %s29_s16 = int_to_ptr.hbm [resolvable:$true] %s28_s16 }
   0x3   :  { %s1857_s17 = smov 128   ;;  %s1858_s18 = smov 8  }
   0x4   :  { %51 = dma.hbm_to_vmem [thread:$0]  %s44_s11, 8192, %s46_s13, [#allocation7], %s1857_s17, %s1857_s17, %s1858_s18  }
   0x5   :  { %s1859_s19 = smov [#allocation4]   ;;  %s1860_s21 = smov 256  }
   0x6   :  { %s30_s20 = sshll.u32 %s1859_s19, 4  ;;  %s1861_s22 = smov 16   ;;  %s31_s20 = int_to_ptr.vmem [resolvable:$true] %s30_s20 }
   0x7   :  { %36 = dma.hbm_to_vmem [thread:$0]  %s29_s16, 2048, %s31_s20, [#allocation5], %s1860_s21, %s1860_s21, %s1861_s22  }
   0x8   :  { %s58_s24 = sshll.u32 %s2199_s7, 4  ;;  %s1862_s25 = smov [#allocation8]   ;;  %s59_s24 = int_to_ptr.hbm [resolvable:$true] %s58_s24 }
   0x9   :  { %s60_s26 = sshll.u32 %s1862_s25, 4  ;;  %s1863_s27 = smov 64   ;;  %s61_s26 = int_to_ptr.vmem [resolvable:$true] %s60_s26 }
   0xa   :  { %s1864_s3 = smov 4  }
   0xb   :  { %66 = dma.hbm_to_vmem [thread:$0]  %s59_s24, 2048, %s61_s26, [#allocation7], %s1863_s27, %s1863_s27, %s1864_s3  }
   0xc   :  { %1852 = dma.done.wait [#allocation5], 2048  }
   0xd   :  { %1853 = vsyncadd [#allocation5], 4294965248 }
   0xe   :  { %1854 = dma.done.wait [#allocation7], 10240  }
   0xf   :  { %1855 = vsyncadd [#allocation7], 4294957056  ;;  %v1297_v0 = vld [vmem:[#allocation4 + $0x60] sm:$0xf]  ;;  %v1676_v1 = vld [vmem:[#allocation4 + $0x6c] sm:$0xf0] }
  0x10   :  { %v1674_v2 = vld [vmem:[#allocation4 + $0x64] sm:$0xf]  ;;  %v1298_v3 = vor.u32 %v1676_v1, %v1297_v0  ;;  %v1299_v4 = vld [vmem:[#allocation4 + $0x70] sm:$0xf0]  ;;  %v1281_v5 = vld [vmem:[#allocation4 + $0x40] sm:$0xf] }
  0x11   :  { %v1672_v6 = vld [vmem:[#allocation4 + $0x4c] sm:$0xf0]  ;;  %v1302_v7 = vor.u32 %v1674_v2, %v1299_v4  ;;  %v1670_v8 = vld [vmem:[#allocation4 + $0x44] sm:$0xf]  ;;  %v1283_v9 = vld [vmem:[#allocation4 + $0x50] sm:$0xf0] }
  0x12   :  { %195 = vmatpush.bf16.msra.mxu2 %v1298_v3  ;;  %v1282_v10 = vor.u32 %v1672_v6, %v1281_v5  ;;  %v1286_v11 = vor.u32 %v1670_v8, %v1283_v9  ;;  %v1265_v12 = vld [vmem:[#allocation4 + $0x20] sm:$0xf]  ;;  %v1668_v13 = vld [vmem:[#allocation4 + $0x2c] sm:$0xf0]  ;;  %v1666_v14 = vld [vmem:[#allocation4 + $0x24] sm:$0xf] }
  0x13   :  { %209 = vmatpush.bf16.msra.mxu3 %v1302_v7  ;;  %v1267_v15 = vld [vmem:[#allocation4 + $0x30] sm:$0xf0]  ;;  %v1266_v16 = vor.u32 %v1668_v13, %v1265_v12  ;;  %v1249_v18 = vld [vmem:[#allocation4] sm:$0xf]  ;;  %v1664_v19 = vld [vmem:[#allocation4 + $0xc] sm:$0xf0] }
  0x14   :  { %v1270_v17 = vor.u32 %v1666_v14, %v1267_v15  ;;  %v1662_v20 = vld [vmem:[#allocation4 + $0x4] sm:$0xf]  ;;  %v1251_v21 = vld [vmem:[#allocation4 + $0x10] sm:$0xf0]  ;;  %v1305_v22 = vld [vmem:[#allocation4 + $0x68] sm:$0xf]  ;;  %v1250_v26 = vor.u32 %v1664_v19, %v1249_v18 }
  0x15   :  { %v1677_v23 = vld [vmem:[#allocation4 + $0x74] sm:$0xf0]  ;;  %v1675_v24 = vld [vmem:[#allocation4 + $0x6c] sm:$0xf]  ;;  %v1307_v25 = vld [vmem:[#allocation4 + $0x78] sm:$0xf0]  ;;  %v1254_v27 = vor.u32 %v1662_v20, %v1251_v21 }
  0x16   :  { %196 = vmatpush.bf16.msra.mxu2 %v1282_v10  ;;  %v1306_v28 = vor.u32 %v1677_v23, %v1305_v22  ;;  %v1310_v29 = vor.u32 %v1675_v24, %v1307_v25  ;;  %v1289_v30 = vld [vmem:[#allocation4 + $0x48] sm:$0xf]  ;;  %v1673_v31 = vld [vmem:[#allocation4 + $0x54] sm:$0xf0]  ;;  %v1661_v32 = vld [vmem:[%s2194_s2] sm:$0xff]  ;;  %vm187_vm0 = vcmask 523264  }
  0x17   :  { %210 = vmatpush.bf16.msra.mxu3 %v1286_v11  ;;  %v1671_v33 = vld [vmem:[#allocation4 + $0x4c] sm:$0xf]  ;;  %v1291_v34 = vld [vmem:[#allocation4 + $0x58] sm:$0xf0]  ;;  %v1290_v35 = vor.u32 %v1673_v31, %v1289_v30  ;;  %v1273_v37 = vld [vmem:[#allocation4 + $0x28] sm:$0xf] }
  0x18   :  { %v1294_v36 = vor.u32 %v1671_v33, %v1291_v34  ;;  %v1669_v38 = vld [vmem:[#allocation4 + $0x34] sm:$0xf0]  ;;  %v1667_v39 = vld [vmem:[#allocation4 + $0x2c] sm:$0xf]  ;;  %v1275_v40 = vld [vmem:[#allocation4 + $0x38] sm:$0xf0] }
  0x19   :  { %v1274_v41 = vor.u32 %v1669_v38, %v1273_v37  ;;  %v1278_v42 = vor.u32 %v1667_v39, %v1275_v40  ;;  %v1257_v43 = vld [vmem:[#allocation4 + $0x8] sm:$0xf]  ;;  %v1665_v44 = vld [vmem:[#allocation4 + $0x14] sm:$0xf0]  ;;  %v1663_v45 = vld [vmem:[#allocation4 + $0xc] sm:$0xf] }
  0x1a   :  { %197 = vmatpush.bf16.msra.mxu2 %v1266_v16  ;;  %v1259_v46 = vld [vmem:[#allocation4 + $0x18] sm:$0xf0]  ;;  %v1258_v47 = vor.u32 %v1665_v44, %v1257_v43  ;;  %v1374_v3 = vld [vmem:[#allocation6 + $0x70] sm:$0xf]  ;;  %v1693_v4 = vld [vmem:[#allocation6 + $0x74] sm:$0xf0] }
  0x1b   :  { %211 = vmatpush.bf16.msra.mxu3 %v1270_v17  ;;  %v1262_v48 = vor.u32 %v1663_v45, %v1259_v46  ;;  %v1375_v7 = vor.u32 %v1693_v4, %v1374_v3  ;;  %v1438_v8 = vld [vmem:[#allocation6 + $0xf0] sm:$0xf]  ;;  %v1709_v9 = vld [vmem:[#allocation6 + $0xf4] sm:$0xf0]  ;;  %v1366_v25 = vld [vmem:[#allocation6 + $0x60] sm:$0xf] }
  0x1c   :  { %v1439_v13 = vor.u32 %v1709_v9, %v1438_v8  ;;  %v1502_v14 = vld [vmem:[#allocation6 + $0x170] sm:$0xf]  ;;  %v1725_v15 = vld [vmem:[#allocation6 + $0x174] sm:$0xf0]  ;;  %v1430_v30 = vld [vmem:[#allocation6 + $0xe0] sm:$0xf] }
  0x1d   :  { %858 = vmatpush.bf16.msra.mxu0 %v1375_v7  ;;  %v1503_v19 = vor.u32 %v1725_v15, %v1502_v14  ;;  %v1566_v20 = vld [vmem:[#allocation6 + $0x1f0] sm:$0xf]  ;;  %v1741_v21 = vld [vmem:[#allocation6 + $0x1f4] sm:$0xf0]  ;;  %v1707_v31 = vld [vmem:[#allocation6 + $0xe4] sm:$0xf0] }
  0x1e   :  { %198 = vmatpush.bf16.msra.mxu2 %v1250_v26  ;;  %872 = vmatpush.bf16.msra.mxu1 %v1439_v13  ;;  %v1567_v24 = vor.u32 %v1741_v21, %v1566_v20  ;;  %v1691_v26 = vld [vmem:[#allocation6 + $0x64] sm:$0xf0]  ;;  %v1358_v46 = vld [vmem:[#allocation6 + $0x50] sm:$0xf]  ;;  %v1737_v7 = vld [vmem:[#allocation6 + $0x1d4] sm:$0xf0] }
  0x1f   :  { %212 = vmatpush.bf16.msra.mxu3 %v1254_v27  ;;  %v1723_v37 = vld [vmem:[#allocation6 + $0x164] sm:$0xf0]  ;;  %v1350_v13 = vld [vmem:[#allocation6 + $0x40] sm:$0xf]  ;;  %vm384_vm5 = vcmask 1040384   ;;  %vm386_vm10 = vcmask 1042434  }
  0x20   :  { %v1687_v14 = vld [vmem:[#allocation6 + $0x44] sm:$0xf0]  ;;  %v1414_v20 = vld [vmem:[#allocation6 + $0xc0] sm:$0xf]  ;;  %vm388_vm15 = vcmask 1041408  }
  0x21   :  { %1311 = vmatmul.msk.bf16.vlgmr.msra.gmra.mxu2 %vm187_vm0, %v1661_v32  ;;  %v1703_v21 = vld [vmem:[#allocation6 + $0xc4] sm:$0xf0] }
  0x22   :  { %223 = vmatpush.bf16.msrb.mxu2 %v1306_v28  ;;  %1312 = vmatmul.msk.bf16.vlgmr.msra.gmra.mxu3 %vm187_vm0, %v1661_v32 }
  0x23   :  { %237 = vmatpush.bf16.msrb.mxu3 %v1310_v29  ;;  %v1367_v29 = vor.u32 %v1691_v26, %v1366_v25  ;;  %v1478_v26 = vld [vmem:[#allocation6 + $0x140] sm:$0xf] }
  0x25   :  { %859 = vmatpush.bf16.msra.mxu0 %v1367_v29 }
  0x26   :  { %224 = vmatpush.bf16.msrb.mxu2 %v1290_v35  ;;  %v1431_v35 = vor.u32 %v1707_v31, %v1430_v30  ;;  %v1351_v31 = vor.u32 %v1687_v14, %v1350_v13  ;;  %v1398_v13 = vld [vmem:[#allocation6 + $0xa0] sm:$0xf] }
  0x27   :  { %238 = vmatpush.bf16.msrb.mxu3 %v1294_v36  ;;  %v1494_v36 = vld [vmem:[#allocation6 + $0x160] sm:$0xf] }
  0x28   :  { %v1495_v40 = vor.u32 %v1723_v37, %v1494_v36  ;;  %873 = vmatpush.bf16.msra.mxu1 %v1431_v35 }
  0x2a   :  { %225 = vmatpush.bf16.msrb.mxu2 %v1274_v41  ;;  %v1558_v41 = vld [vmem:[#allocation6 + $0x1e0] sm:$0xf] }
  0x2b   :  { %239 = vmatpush.bf16.msrb.mxu3 %v1278_v42  ;;  %v1739_v42 = vld [vmem:[#allocation6 + $0x1e4] sm:$0xf0] }
  0x2c   :  { %v1559_v45 = vor.u32 %v1739_v42, %v1558_v41 }
  0x2e   :  { %226 = vmatpush.bf16.msrb.mxu2 %v1258_v47  ;;  %v1689_v47 = vld [vmem:[#allocation6 + $0x54] sm:$0xf0] }
  0x2f   :  { %240 = vmatpush.bf16.msrb.mxu3 %v1262_v48 }
  0x31   :  { %1313 = vmatmul.msk.bf16.vlgmr.msrb.gmra.mxu2 %vm187_vm0, %v1661_v32 }
  0x32   :  { %1314 = vmatmul.msk.bf16.vlgmr.msrb.gmra.mxu3 %vm187_vm0, %v1661_v32  ;;  %886 = vmatpush.bf16.msra.mxu2 %v1503_v19  ;;  %v1958_v32 = vstv %s2193_s1 }
  0x33   :  { %900 = vmatpush.bf16.msra.mxu3 %v1567_v24 }
  0x36   :  { %887 = vmatpush.bf16.msra.mxu2 %v1495_v40 }
  0x37   :  { %901 = vmatpush.bf16.msra.mxu3 %v1559_v45 }
  0xa4   :  { %v1931_v49 = vpop.f32.mrf.mxu2 }
  0xa5   :  { %v1933_v50 = vpop.f32.mrf.mxu3  ;;  %v280_v52 = vmul.f32 %v1931_v49, %v1931_v49 }
  0xa6   :  { %v281_v56 = vmul.f32 %v1933_v50, %v1933_v50 }
  0xac   :  { %v1935_v51 = vpop.f32.mrf.mxu2 }
  0xad   :  { %v247_v53 = vadd.f32 %v1935_v51, %v1931_v49  ;;  %v284_v54 = vmul.f32 %v1935_v51, %v1935_v51  ;;  %v1943_v55 = vpop.f32.mrf.mxu3 }
  0xae   :  { %v254_v57 = vadd.f32 %v1943_v55, %v1933_v50  ;;  %v285_v58 = vmul.f32 %v1943_v55, %v1943_v55 }
  0xaf   :  { %v248_v59 = vrot.slane %v247_v53, 4  ;;  %v288_v60 = vadd.f32 %v284_v54, %v280_v52  ;;  %v1359_v54 = vor.u32 %v1689_v47, %v1358_v46 }
  0xb0   :  { %v255_v61 = vrot.slane %v254_v57, 4  ;;  %v295_v62 = vadd.f32 %v285_v58, %v281_v56  ;;  %v1422_v56 = vld [vmem:[#allocation6 + $0xd0] sm:$0xf] }
  0xb1   :  { %v249_v63 = vadd.f32 %v248_v59, %v247_v53  ;;  %v289_v0 = vrot.slane %v288_v60, 4  ;;  %860 = vmatpush.bf16.msra.mxu0 %v1359_v54 }
  0xb2   :  { %v256_v1 = vadd.f32 %v255_v61, %v254_v57  ;;  %v296_v2 = vrot.slane %v295_v62, 4  ;;  %v1705_v57 = vld [vmem:[#allocation6 + $0xd4] sm:$0xf0] }
  0xb3   :  { %v250_v5 = vrot.slane %v249_v63, 2  ;;  %v290_v6 = vadd.f32 %v289_v0, %v288_v60  ;;  %v1721_v0 = vld [vmem:[#allocation6 + $0x154] sm:$0xf0] }
  0xb4   :  { %v257_v10 = vrot.slane %v256_v1, 2  ;;  %v297_v11 = vadd.f32 %v296_v2, %v295_v62  ;;  %v1951_v12 = vpop.f32.mrf.mxu2  ;;  %v1423_v62 = vor.u32 %v1705_v57, %v1422_v56  ;;  %v1701_v57 = vld [vmem:[#allocation6 + $0xb4] sm:$0xf0] }
  0xb5   :  { %v251_v16 = vadd.f32 %v250_v5, %v249_v63  ;;  %v291_v17 = vrot.slane %v290_v6, 2  ;;  %v1953_v18 = vpop.f32.mrf.mxu3  ;;  %v282_v53 = vmul.f32 %v1951_v12, %v1951_v12  ;;  %v1486_v63 = vld [vmem:[#allocation6 + $0x150] sm:$0xf]  ;;  %861 = vmatpush.bf16.msra.mxu0 %v1351_v31 }
  0xb6   :  { %v258_v22 = vadd.f32 %v257_v10, %v256_v1  ;;  %v298_v23 = vrot.slane %v297_v11, 2  ;;  %v283_v60 = vmul.f32 %v1953_v18, %v1953_v18  ;;  %874 = vmatpush.bf16.msra.mxu1 %v1423_v62  ;;  %v1487_v19 = vor.u32 %v1721_v0, %v1486_v63  ;;  %v1717_v63 = vld [vmem:[#allocation6 + $0x134] sm:$0xf0]  ;;  %v1534_v0 = vld [vmem:[#allocation6 + $0x1b0] sm:$0xf] }
  0xb7   :  { %v252_v27 = vrot.slane %v251_v16, 1  ;;  %v292_v28 = vadd.f32 %v291_v17, %v290_v6  ;;  %v1550_v6 = vld [vmem:[#allocation6 + $0x1d0] sm:$0xf] }
  0xb8   :  { %v259_v33 = vrot.slane %v258_v22, 1  ;;  %v299_v34 = vadd.f32 %v298_v23, %v297_v11  ;;  %v1551_v25 = vor.u32 %v1737_v7, %v1550_v6  ;;  %888 = vmatpush.bf16.msra.mxu2 %v1487_v19  ;;  %v1733_v6 = vld [vmem:[#allocation6 + $0x1b4] sm:$0xf0]  ;;  %v1334_v7 = vld [vmem:[#allocation6 + $0x20] sm:$0xf] }
  0xb9   :  { %v253_v38 = vadd.f32 %v252_v27, %v251_v16  ;;  %v293_v39 = vrot.slane %v292_v28, 1  ;;  %v1719_v27 = vld [vmem:[#allocation6 + $0x144] sm:$0xf0] }
  0xba   :  { %v260_v43 = vadd.f32 %v259_v33, %v258_v22  ;;  %v300_v44 = vrot.slane %v299_v34, 1  ;;  %v1542_v33 = vld [vmem:[#allocation6 + $0x1c0] sm:$0xf]  ;;  %902 = vmatpush.bf16.msra.mxu3 %v1551_v25  ;;  %v1699_v19 = vld [vmem:[#allocation6 + $0xa4] sm:$0xf0] }
  0xbb   :  { %v1961_v48 = vmul.f32 %v1958_v32, %v253_v38  ;;  %v294_v52 = vadd.f32 %v293_v39, %v292_v28  ;;  %v1415_v38 = vor.u32 %v1703_v21, %v1414_v20  ;;  %v1342_v39 = vld [vmem:[#allocation6 + $0x30] sm:$0xf]  ;;  %v1462_v20 = vld [vmem:[#allocation6 + $0x120] sm:$0xf] }
  0xbc   :  { %v1966_v58 = vmul.f32 %v1958_v32, %v260_v43  ;;  %v301_v59 = vadd.f32 %v300_v44, %v299_v34  ;;  %v1970_v61 = vpop.f32.mrf.mxu2  ;;  %v1735_v34 = vld [vmem:[#allocation6 + $0x1c4] sm:$0xf0]  ;;  %v1479_v43 = vor.u32 %v1719_v27, %v1478_v26  ;;  %v1685_v44 = vld [vmem:[#allocation6 + $0x34] sm:$0xf0] }
  0xbd   :  { %v316_v1 = vmul.f32 %v294_v52, %v1958_v32  ;;  %v320_v2 = vmul.f32 %v1961_v48, %v1961_v48  ;;  %v261_v3 = vadd.f32 %v1970_v61, %v1951_v12  ;;  %v286_v4 = vmul.f32 %v1970_v61, %v1970_v61  ;;  %v1979_v5 = vpop.f32.mrf.mxu3  ;;  %875 = vmatpush.bf16.msra.mxu1 %v1415_v38 }
  0xbe   :  { %v317_v8 = vmul.f32 %v301_v59, %v1958_v32  ;;  %v321_v9 = vmul.f32 %v1966_v58, %v1966_v58  ;;  %v268_v10 = vadd.f32 %v1979_v5, %v1953_v18  ;;  %v287_v11 = vmul.f32 %v1979_v5, %v1979_v5  ;;  %889 = vmatpush.bf16.msra.mxu2 %v1479_v43  ;;  %v1470_v59 = vld [vmem:[#allocation6 + $0x130] sm:$0xf] }
  0xbf   :  { %v324_v15 = vsub.f32 %v316_v1, %v320_v2  ;;  %v262_v16 = vrot.slane %v261_v3, 4  ;;  %v302_v17 = vadd.f32 %v286_v4, %v282_v53  ;;  %v1543_v52 = vor.u32 %v1735_v34, %v1542_v33  ;;  %v1406_v53 = vld [vmem:[#allocation6 + $0xb0] sm:$0xf] }
  0xc0   :  { %v325_v22 = vsub.f32 %v317_v8, %v321_v9  ;;  %v269_v23 = vrot.slane %v268_v10, 4  ;;  %v309_v24 = vadd.f32 %v287_v11, %v283_v60  ;;  %v1407_v4 = vor.u32 %v1701_v57, %v1406_v53  ;;  %v1683_v11 = vld [vmem:[#allocation6 + $0x24] sm:$0xf0]  ;;  %v1454_v43 = vld [vmem:[#allocation6 + $0x110] sm:$0xf] }
  0xc1   :  { %v328_v28 = vmax.f32 %v324_v15, 0.0  ;;  %v263_v29 = vadd.f32 %v262_v16, %v261_v3  ;;  %v303_v30 = vrot.slane %v302_v17, 4  ;;  %903 = vmatpush.bf16.msra.mxu3 %v1543_v52  ;;  %v1343_v3 = vor.u32 %v1685_v44, %v1342_v39  ;;  %v1713_v52 = vld [vmem:[#allocation6 + $0x114] sm:$0xf0]  ;;  %v1518_v53 = vld [vmem:[#allocation6 + $0x190] sm:$0xf] }
  0xc2   :  { %v329_v35 = vmax.f32 %v325_v22, 0.0  ;;  %v270_v36 = vadd.f32 %v269_v23, %v268_v10  ;;  %v310_v37 = vrot.slane %v309_v24, 4  ;;  %v1471_v10 = vor.u32 %v1717_v63, %v1470_v59  ;;  %876 = vmatpush.bf16.msra.mxu1 %v1407_v4  ;;  %v1679_v63 = vld [vmem:[#allocation6 + $0x4] sm:$0xf0]  ;;  %v1382_v4 = vld [vmem:[#allocation6 + $0x80] sm:$0xf] }
  0xc3   :  { %v1988_v40 = vadd.f32 1e-05, %v328_v28  ;;  %v264_v41 = vrot.slane %v263_v29, 2  ;;  %v304_v42 = vadd.f32 %v303_v30, %v302_v17  ;;  %862 = vmatpush.bf16.msra.mxu0 %v1343_v3  ;;  %v1535_v16 = vor.u32 %v1733_v6, %v1534_v0  ;;  %v1731_v30 = vld [vmem:[#allocation6 + $0x1a4] sm:$0xf0] }
  0xc4   :  { %v1990_v45 = vadd.f32 1e-05, %v329_v35  ;;  %v271_v46 = vrot.slane %v270_v36, 2  ;;  %v311_v47 = vadd.f32 %v310_v37, %v309_v24  ;;  %v1335_v17 = vor.u32 %v1683_v11, %v1334_v7  ;;  %890 = vmatpush.bf16.msra.mxu2 %v1471_v10  ;;  %v1715_v24 = vld [vmem:[#allocation6 + $0x124] sm:$0xf0] }
  0xc5   :  { %1768 = vrsqrt.f32 %v1988_v40  ;;  %v265_v54 = vadd.f32 %v264_v41, %v263_v29  ;;  %v305_v56 = vrot.slane %v304_v42, 2  ;;  %v1399_v23 = vor.u32 %v1699_v19, %v1398_v13  ;;  %904 = vmatpush.bf16.msra.mxu3 %v1535_v16  ;;  %v1526_v29 = vld [vmem:[#allocation6 + $0x1a0] sm:$0xf]  ;;  %v1326_v35 = vld [vmem:[#allocation6 + $0x10] sm:$0xf] }
  0xc6   :  { %1770 = vrsqrt.f32 %v1990_v45  ;;  %v272_v60 = vadd.f32 %v271_v46, %v270_v36  ;;  %v312_v62 = vrot.slane %v311_v47, 2  ;;  %v1463_v28 = vor.u32 %v1715_v24, %v1462_v20  ;;  %v1681_v36 = vld [vmem:[#allocation6 + $0x14] sm:$0xf0]  ;;  %v1390_v37 = vld [vmem:[#allocation6 + $0x90] sm:$0xf] }
  0xc7   :  { %v266_v1 = vrot.slane %v265_v54, 1  ;;  %v306_v2 = vadd.f32 %v305_v56, %v304_v42  ;;  %863 = vmatpush.bf16.msra.mxu0 %v1335_v17  ;;  %877 = vmatpush.bf16.msra.mxu1 %v1399_v23  ;;  %v1697_v42 = vld [vmem:[#allocation6 + $0x94] sm:$0xf0]  ;;  %v1327_v57 = vor.u32 %v1681_v36, %v1326_v35  ;;  %v1695_v6 = vld [vmem:[#allocation6 + $0x84] sm:$0xf0]  ;;  %vm353_vm2 = vweird.f32 %v1990_v45 }
  0xc8   :  { %v273_v8 = vrot.slane %v272_v60, 1  ;;  %v313_v9 = vadd.f32 %v312_v62, %v311_v47  ;;  %891 = vmatpush.bf16.msra.mxu2 %v1463_v28  ;;  %v1527_v47 = vor.u32 %v1731_v30, %v1526_v29  ;;  %v1391_v59 = vor.u32 %v1697_v42, %v1390_v37  ;;  %v1318_v62 = vld [vmem:[#allocation6] sm:$0xf]  ;;  %v1711_v11 = vld [vmem:[#allocation6 + $0x104] sm:$0xf0] }
  0xc9   :  { %v267_v14 = vadd.f32 %v266_v1, %v265_v54  ;;  %v307_v15 = vrot.slane %v306_v2, 1  ;;  %v1446_v10 = vld [vmem:[#allocation6 + $0x100] sm:$0xf]  ;;  %v1727_v16 = vld [vmem:[#allocation6 + $0x184] sm:$0xf0]  ;;  %vm343_vm13 = vweird.f32 %v1988_v40 }
  0xca   :  { %v274_v21 = vadd.f32 %v273_v8, %v272_v60  ;;  %v314_v22 = vrot.slane %v313_v9, 1  ;;  %v1729_v60 = vld [vmem:[#allocation6 + $0x194] sm:$0xf0]  ;;  %905 = vmatpush.bf16.msra.mxu3 %v1527_v47  ;;  %v1319_v8 = vor.u32 %v1679_v63, %v1318_v62  ;;  %v1692_v20 = vld [vmem:[#allocation6 + $0x74] sm:$0xf] }
  0xcb   :  { %v1994_v25 = vpop.eup %1768  ;;  %v1997_v26 = vmul.f32 %v1958_v32, %v267_v14  ;;  %v308_v27 = vadd.f32 %v307_v15, %v306_v2  ;;  %v1455_v2 = vor.u32 %v1713_v52, %v1454_v43  ;;  %v1519_v3 = vor.u32 %v1729_v60, %v1518_v53  ;;  %864 = vmatpush.bf16.msra.mxu0 %v1327_v57  ;;  %v1510_v15 = vld [vmem:[#allocation6 + $0x180] sm:$0xf]  ;;  %v1376_v24 = vld [vmem:[#allocation6 + $0x78] sm:$0xf0]  ;;  %v1724_v30 = vld [vmem:[#allocation6 + $0x174] sm:$0xf] }
  0xcc   :  { %v1999_v31 = vpop.eup %1770  ;;  %v2002_v33 = vmul.f32 %v1958_v32, %v274_v21  ;;  %v315_v34 = vadd.f32 %v314_v22, %v313_v9  ;;  %v338_v0 = vmul.f32 %v1994_v25, %v1988_v40  ;;  %878 = vmatpush.bf16.msra.mxu1 %v1391_v59  ;;  %v1383_v9 = vor.u32 %v1695_v6, %v1382_v4  ;;  %v1440_v29 = vld [vmem:[#allocation6 + $0xf8] sm:$0xf0]  ;;  %v1740_v36 = vld [vmem:[#allocation6 + $0x1f4] sm:$0xf]  ;;  %v1368_v42 = vld [vmem:[#allocation6 + $0x68] sm:$0xf0] }
  0xcd   :  { %v348_v38 = vmul.f32 %v1999_v31, %v1990_v45  ;;  %v318_v39 = vmul.f32 %v308_v27, %v1958_v32  ;;  %v322_v41 = vmul.f32 %v1997_v26, %v1997_v26  ;;  %892 = vmatpush.bf16.msra.mxu2 %v1455_v2  ;;  %v1447_v14 = vor.u32 %v1711_v11, %v1446_v10  ;;  %v1708_v27 = vld [vmem:[#allocation6 + $0xf4] sm:$0xf]  ;;  %v1568_v37 = vld [vmem:[#allocation6 + $0x1f8] sm:$0xf0]  ;;  %v1706_v43 = vld [vmem:[#allocation6 + $0xe4] sm:$0xf] }
  0xce   :  { %v319_v44 = vmul.f32 %v315_v34, %v1958_v32  ;;  %v323_v46 = vmul.f32 %v2002_v33, %v2002_v33  ;;  %v339_v21 = vmul.f32 %v1994_v25, %v338_v0  ;;  %906 = vmatpush.bf16.msra.mxu3 %v1519_v3  ;;  %v1511_v23 = vor.u32 %v1727_v16, %v1510_v15  ;;  %v1504_v34 = vld [vmem:[#allocation6 + $0x178] sm:$0xf0]  ;;  %v1738_v59 = vld [vmem:[#allocation6 + $0x1e4] sm:$0xf]  ;;  %v1560_v60 = vld [vmem:[#allocation6 + $0x1e8] sm:$0xf0] }
  0xcf   :  { %v349_v54 = vmul.f32 %v1999_v31, %v348_v38  ;;  %v326_v56 = vsub.f32 %v318_v39, %v322_v41  ;;  %865 = vmatpush.bf16.msra.mxu0 %v1319_v8  ;;  %v1379_v28 = vor.u32 %v1692_v20, %v1376_v24  ;;  %v1443_v35 = vor.u32 %v1708_v27, %v1440_v29  ;;  %v1690_v38 = vld [vmem:[#allocation6 + $0x64] sm:$0xf]  ;;  %v1688_v62 = vld [vmem:[#allocation6 + $0x54] sm:$0xf]  ;;  %v1360_v0 = vld [vmem:[#allocation6 + $0x58] sm:$0xf0] }
  0xd0   :  { %v327_v1 = vsub.f32 %v319_v44, %v323_v46  ;;  %879 = vmatpush.bf16.msra.mxu1 %v1383_v9  ;;  %v1507_v39 = vor.u32 %v1724_v30, %v1504_v34  ;;  %v1571_v41 = vor.u32 %v1740_v36, %v1568_v37  ;;  %v1432_v44 = vld [vmem:[#allocation6 + $0xe8] sm:$0xf0]  ;;  %v2022_v46 = vmul.f32 0.5, %v339_v21  ;;  %v1424_v2 = vld [vmem:[#allocation6 + $0xd8] sm:$0xf0] }
  0xd1   :  { %v330_v7 = vmax.f32 %v326_v56, 0.0  ;;  %v350_v17 = vmul.f32 0.5, %v349_v54  ;;  %893 = vmatpush.bf16.msra.mxu2 %v1447_v14  ;;  %v1371_v52 = vor.u32 %v1690_v38, %v1368_v42  ;;  %v1435_v53 = vor.u32 %v1706_v43, %v1432_v44  ;;  %v1722_v54 = vld [vmem:[#allocation6 + $0x164] sm:$0xf]  ;;  %v1496_v56 = vld [vmem:[#allocation6 + $0x168] sm:$0xf0] }
  0xd2   :  { %v331_v13 = vmax.f32 %v327_v1, 0.0  ;;  %907 = vmatpush.bf16.msra.mxu3 %v1511_v23  ;;  %v1499_v57 = vor.u32 %v1722_v54, %v1496_v56  ;;  %v1563_v63 = vor.u32 %v1738_v59, %v1560_v60  ;;  %v1704_v1 = vld [vmem:[#allocation6 + $0xd4] sm:$0xf]  ;;  %v1363_v4 = vor.u32 %v1688_v62, %v1360_v0  ;;  %v1552_v14 = vld [vmem:[#allocation6 + $0x1d8] sm:$0xf0] }
  0xd3   :  { %v2015_v19 = vadd.f32 1e-05, %v330_v7  ;;  %914 = vmatpush.bf16.msrb.mxu0 %v1379_v28  ;;  %v351_v47 = vsub.f32 1.5, %v350_v17  ;;  %v1720_v6 = vld [vmem:[#allocation6 + $0x154] sm:$0xf]  ;;  %vm354_vm1 = vweird.f32 %v1999_v31  ;;  %v341_v30 = vsub.f32 1.5, %v2022_v46 }
  0xd4   :  { %v2018_v22 = vadd.f32 1e-05, %v331_v13  ;;  %928 = vmatpush.bf16.msrb.mxu1 %v1443_v35  ;;  %v1488_v7 = vld [vmem:[#allocation6 + $0x158] sm:$0xf0]  ;;  %v1736_v8 = vld [vmem:[#allocation6 + $0x1d4] sm:$0xf]  ;;  %v1427_v13 = vor.u32 %v1704_v1, %v1424_v2  ;;  %vm2039_vm3 = vmor %vm353_vm2, %vm354_vm1  ;;  %vm344_vm12 = vweird.f32 %v1994_v25 }
  0xd5   :  { %1772 = vrsqrt.f32 %v2015_v19  ;;  %942 = vmatpush.bf16.msrb.mxu2 %v1507_v39  ;;  %v352_v10 = vmul.f32 %v1999_v31, %v351_v47  ;;  %v1686_v15 = vld [vmem:[#allocation6 + $0x44] sm:$0xf]  ;;  %v1352_v16 = vld [vmem:[#allocation6 + $0x48] sm:$0xf0]  ;;  %v1491_v20 = vor.u32 %v1720_v6, %v1488_v7  ;;  %v1555_v21 = vor.u32 %v1736_v8, %v1552_v14  ;;  %v1684_v46 = vld [vmem:[#allocation6 + $0x34] sm:$0xf] }
  0xd6   :  { %1774 = vrsqrt.f32 %v2018_v22  ;;  %956 = vmatpush.bf16.msrb.mxu3 %v1571_v41  ;;  %v1702_v23 = vld [vmem:[#allocation6 + $0xc4] sm:$0xf]  ;;  %v1416_v24 = vld [vmem:[#allocation6 + $0xc8] sm:$0xf0]  ;;  %v1355_v36 = vor.u32 %v1686_v15, %v1352_v16  ;;  %vm363_vm7 = vweird.f32 %v2015_v19  ;;  %v1344_v47 = vld [vmem:[#allocation6 + $0x38] sm:$0xf0]  ;;  %vm373_vm9 = vweird.f32 %v2018_v22 }
  0xd7   :  { %915 = vmatpush.bf16.msrb.mxu0 %v1371_v52  ;;  %v1718_v28 = vld [vmem:[#allocation6 + $0x144] sm:$0xf]  ;;  %v1480_v29 = vld [vmem:[#allocation6 + $0x148] sm:$0xf0]  ;;  %v356_v39 = vsel %vm2039_vm3, %v1999_v31, %v352_v10  ;;  %v1419_v41 = vor.u32 %v1702_v23, %v1416_v24  ;;  %v1700_v31 = vld [vmem:[#allocation6 + $0xb4] sm:$0xf]  ;;  %v1347_v59 = vor.u32 %v1684_v46, %v1344_v47  ;;  %v342_v0 = vmul.f32 %v1994_v25, %v341_v30 }
  0xd8   :  { %929 = vmatpush.bf16.msrb.mxu1 %v1435_v53  ;;  %v1734_v45 = vld [vmem:[#allocation6 + $0x1c4] sm:$0xf]  ;;  %v1544_v37 = vld [vmem:[#allocation6 + $0x1c8] sm:$0xf0]  ;;  %v1483_v43 = vor.u32 %v1718_v28, %v1480_v29  ;;  %v1408_v54 = vld [vmem:[#allocation6 + $0xb8] sm:$0xf0]  ;;  %v452_v24 = vlaneseq }
  0xd9   :  { %943 = vmatpush.bf16.msrb.mxu2 %v1499_v57  ;;  %v1547_v44 = vor.u32 %v1734_v45, %v1544_v37  ;;  %v381_v57 = vrot.slane %v356_v39, 7  ;;  %v1716_v60 = vld [vmem:[#allocation6 + $0x134] sm:$0xf]  ;;  %v1472_v62 = vld [vmem:[#allocation6 + $0x138] sm:$0xf0]  ;;  %vm2079_vm14 = vmor %vm343_vm13, %vm344_vm12 }
  0xda   :  { %957 = vmatpush.bf16.msrb.mxu3 %v1563_v63  ;;  %v1732_v1 = vld [vmem:[#allocation6 + $0x1b4] sm:$0xf]  ;;  %v1536_v2 = vld [vmem:[#allocation6 + $0x1b8] sm:$0xf0]  ;;  %v1475_v7 = vor.u32 %v1716_v60, %v1472_v62  ;;  %v1336_v10 = vld [vmem:[#allocation6 + $0x28] sm:$0xf0] }
  0xdb   :  { %v2024_v3 = vpop.eup %1772  ;;  %916 = vmatpush.bf16.msrb.mxu0 %v1363_v4  ;;  %v1682_v4 = vld [vmem:[#allocation6 + $0x24] sm:$0xf]  ;;  %v1539_v8 = vor.u32 %v1732_v1, %v1536_v2  ;;  %v1464_v16 = vld [vmem:[#allocation6 + $0x128] sm:$0xf0]  ;;  %v1680_v30 = vld [vmem:[#allocation6 + $0x14] sm:$0xf] }
  0xdc   :  { %v2026_v9 = vpop.eup %1774  ;;  %v358_v11 = vmul.f32 %v2024_v3, %v2015_v19  ;;  %vm364_vm4 = vweird.f32 %v2024_v3  ;;  %930 = vmatpush.bf16.msrb.mxu1 %v1427_v13  ;;  %v1400_v13 = vld [vmem:[#allocation6 + $0xa8] sm:$0xf0]  ;;  %v1714_v15 = vld [vmem:[#allocation6 + $0x124] sm:$0xf]  ;;  %v1328_v34 = vld [vmem:[#allocation6 + $0x18] sm:$0xf0] }
  0xdd   :  { %v368_v17 = vmul.f32 %v2026_v9, %v2018_v22  ;;  %vm374_vm6 = vweird.f32 %v2026_v9  ;;  %944 = vmatpush.bf16.msrb.mxu2 %v1491_v20  ;;  %vm2052_vm8 = vmor %vm363_vm7, %vm364_vm4  ;;  %v1411_v22 = vor.u32 %v1700_v31, %v1408_v54  ;;  %v332_v20 = vld [vmem:[%s2196_s4] ss:$2 sm:$0xf]  ;;  %v1528_v40 = vld [vmem:[#allocation6 + $0x1a8] sm:$0xf0]  ;;  %v453_v47 = vshrl.u32 %v452_v24, 7 }
  0xde   :  { %v359_v27 = vmul.f32 %v2024_v3, %v358_v11  ;;  %958 = vmatpush.bf16.msrb.mxu3 %v1555_v21  ;;  %vm2059_vm11 = vmor %vm373_vm9, %vm374_vm6  ;;  %v1698_v11 = vld [vmem:[#allocation6 + $0xa4] sm:$0xf]  ;;  %v1696_v45 = vld [vmem:[#allocation6 + $0x94] sm:$0xf] }
  0xdf   :  { %v369_v35 = vmul.f32 %v2026_v9, %v368_v17  ;;  %917 = vmatpush.bf16.msrb.mxu0 %v1355_v36  ;;  %v1730_v17 = vld [vmem:[#allocation6 + $0x1a4] sm:$0xf]  ;;  %v1403_v29 = vor.u32 %v1698_v11, %v1400_v13  ;;  %v1392_v37 = vld [vmem:[#allocation6 + $0x98] sm:$0xf0]  ;;  %v1320_v54 = vld [vmem:[#allocation6 + $0x8] sm:$0xf0] }
  0xe0   :  { %v360_v38 = vmul.f32 0.5, %v359_v27  ;;  %931 = vmatpush.bf16.msrb.mxu1 %v1419_v41  ;;  %v1339_v27 = vor.u32 %v1682_v4, %v1336_v10  ;;  %v1531_v36 = vor.u32 %v1730_v17, %v1528_v40  ;;  %v1395_v31 = vor.u32 %v1696_v45, %v1392_v37  ;;  %v1384_v56 = vld [vmem:[#allocation6 + $0x88] sm:$0xf0]  ;;  %v1710_v60 = vld [vmem:[#allocation6 + $0x104] sm:$0xf] }
  0xe1   :  { %v370_v42 = vmul.f32 0.5, %v369_v35  ;;  %945 = vmatpush.bf16.msrb.mxu2 %v1483_v43  ;;  %v1467_v35 = vor.u32 %v1714_v15, %v1464_v16  ;;  %v1728_v43 = vld [vmem:[#allocation6 + $0x194] sm:$0xf]  ;;  %v1448_v62 = vld [vmem:[#allocation6 + $0x108] sm:$0xf0]  ;;  %v454_v13 = vadd.s32 8, %v453_v47 }
  0xe2   :  { %v361_v52 = vsub.f32 1.5, %v360_v38  ;;  %959 = vmatpush.bf16.msrb.mxu3 %v1547_v44  ;;  %v1712_v38 = vld [vmem:[#allocation6 + $0x114] sm:$0xf]  ;;  %v1520_v44 = vld [vmem:[#allocation6 + $0x198] sm:$0xf0] }
  0xe3   :  { %v371_v19 = vsub.f32 1.5, %v370_v42  ;;  %918 = vmatpush.bf16.msrb.mxu0 %v1347_v59  ;;  %v1456_v42 = vld [vmem:[#allocation6 + $0x118] sm:$0xf0]  ;;  %v1523_v59 = vor.u32 %v1728_v43, %v1520_v44  ;;  %v1512_v4 = vld [vmem:[#allocation6 + $0x188] sm:$0xf0] }
  0xe4   :  { %v362_v63 = vmul.f32 %v2024_v3, %v361_v52  ;;  %932 = vmatpush.bf16.msrb.mxu1 %v1411_v22  ;;  %v1331_v52 = vor.u32 %v1680_v30, %v1328_v34 }
  0xe5   :  { %v372_v6 = vmul.f32 %v2026_v9, %v371_v19  ;;  %946 = vmatpush.bf16.msrb.mxu2 %v1475_v7  ;;  %v1694_v19 = vld [vmem:[#allocation6 + $0x84] sm:$0xf] }
  0xe6   :  { %v366_v14 = vsel %vm2052_vm8, %v2024_v3, %v362_v63  ;;  %960 = vmatpush.bf16.msrb.mxu3 %v1539_v8  ;;  %v1726_v63 = vld [vmem:[#allocation6 + $0x184] sm:$0xf]  ;;  %v1387_v11 = vor.u32 %v1694_v19, %v1384_v56 }
  0xe7   :  { %v376_v21 = vsel %vm2059_vm11, %v2026_v9, %v372_v6  ;;  %v382_v23 = vrot.slane %v366_v14, 6  ;;  %v346_v9 = vsel %vm2079_vm14, %v1994_v25, %v342_v0  ;;  %919 = vmatpush.bf16.msrb.mxu0 %v1339_v27  ;;  %v1678_v25 = vld [vmem:[#allocation6 + $0x4] sm:$0xf]  ;;  %v1451_v14 = vor.u32 %v1710_v60, %v1448_v62 }
  0xe8   :  { %v383_v28 = vrot.slane %v376_v21, 5  ;;  %v385_v39 = vsel %vm384_vm5, %v346_v9, %v381_v57  ;;  %933 = vmatpush.bf16.msrb.mxu1 %v1403_v29  ;;  %v1459_v57 = vor.u32 %v1712_v38, %v1456_v42  ;;  %v1323_v6 = vor.u32 %v1678_v25, %v1320_v54 }
  0xe9   :  { %947 = vmatpush.bf16.msrb.mxu2 %v1467_v35  ;;  %v1515_v15 = vor.u32 %v1726_v63, %v1512_v4 }
  0xea   :  { %v387_v41 = vsel %vm386_vm10, %v382_v23, %v383_v28  ;;  %961 = vmatpush.bf16.msrb.mxu3 %v1531_v36 }
  0xeb   :  { %v389_v46 = vsel %vm388_vm15, %v385_v39, %v387_v41  ;;  %920 = vmatpush.bf16.msrb.mxu0 %v1331_v52 }
  0xec   :  { %v391_v53 = vmul.f32 %v389_v46, %v332_v20  ;;  %934 = vmatpush.bf16.msrb.mxu1 %v1395_v31 }
  0xed   :  { %948 = vmatpush.bf16.msrb.mxu2 %v1459_v57 }
  0xee   :  { %v395_v0 = vperm.slane %v391_v53, 0  ;;  %v396_v22 = vperm.slane %v391_v53, 1  ;;  %v397_v1 = vperm.slane %v391_v53, 2  ;;  %v398_v2 = vperm.slane %v391_v53, 3  ;;  %962 = vmatpush.bf16.msrb.mxu3 %v1523_v59 }
  0xef   :  { %921 = vmatpush.bf16.msrb.mxu0 %v1323_v6 }
  0xf0   :  { %v404_v7 = vmul.f32 %v396_v22, %v1966_v58  ;;  %v405_v8 = vmul.f32 %v397_v1, %v1997_v26  ;;  %v406_v10 = vmul.f32 %v398_v2, %v2002_v33  ;;  %v403_v16 = vmul.f32 %v395_v0, %v1961_v48  ;;  %v1315_v58 = vld [vmem:[%s2196_s4 + $0x1] ss:$2 sm:$0xf]  ;;  %935 = vmatpush.bf16.msrb.mxu1 %v1387_v11 }
  0xf1   :  { %v455_v26 = vstv %s2192_s0  ;;  %949 = vmatpush.bf16.msrb.mxu2 %v1451_v14  ;;  %v422_v3 = vmul.f32 %v398_v2, %v1953_v18  ;;  %v426_v28 = vmul.f32 %v398_v2, %v1979_v5  ;;  %v419_v29 = vmul.f32 %v395_v0, %v1931_v49 }
  0xf2   :  { %v411_v17 = vrot.slane %v404_v7, 7  ;;  %v412_v20 = vrot.slane %v405_v8, 6  ;;  %v413_v21 = vrot.slane %v406_v10, 5  ;;  %vm2102_vm0 = vcmp.lt.s32.totalorder %v453_v47, %v455_v26  ;;  %963 = vmatpush.bf16.msrb.mxu3 %v1515_v15 }
  0xf3   :  { %vm2106_vm1 = vcmp.lt.s32.totalorder %v454_v13, %v455_v26  ;;  %v423_v30 = vmul.f32 %v395_v0, %v1935_v51  ;;  %v420_v45 = vmul.f32 %v396_v22, %v1933_v50  ;;  %v424_v37 = vmul.f32 %v396_v22, %v1943_v55 }
  0xf4   :  { %v414_v33 = vsel %vm384_vm5, %v403_v16, %v411_v17  ;;  %v415_v23 = vsel %vm386_vm10, %v412_v20, %v413_v21  ;;  %v421_v38 = vmul.f32 %v397_v1, %v1951_v12  ;;  %v425_v39 = vmul.f32 %v397_v1, %v1970_v61  ;;  %vm2122_vm2 = vmpackc.low %vm2106_vm1, %vm2102_vm0 }
  0xf5   :  { %v416_v48 = vsel %vm388_vm15, %v414_v33, %v415_v23 }
  0xf6   :  { %v418_v24 = vsub.f32 %v1315_v58, %v416_v48 }
  0xf8   :  { %v431_v34 = vperm.slane %v418_v24, 3  ;;  %v428_v9 = vperm.slane %v418_v24, 0  ;;  %v429_v35 = vperm.slane %v418_v24, 1  ;;  %v430_v36 = vperm.slane %v418_v24, 2 }
  0xfa   :  { %v439_v41 = vadd.f32 %v431_v34, %v422_v3  ;;  %v443_v18 = vadd.f32 %v431_v34, %v426_v28  ;;  %v436_v42 = vadd.f32 %v428_v9, %v419_v29  ;;  %v440_v5 = vadd.f32 %v428_v9, %v423_v30 }
  0xfb   :  { %v437_v43 = vadd.f32 %v429_v35, %v420_v45  ;;  %v441_v49 = vadd.f32 %v429_v35, %v424_v37  ;;  %v438_v44 = vadd.f32 %v430_v36, %v421_v38  ;;  %v442_v51 = vadd.f32 %v430_v36, %v425_v39 }
  0xfc   :  { %v447_v46 = vmax.f32 %v439_v41, 0.0  ;;  %v451_v47 = vmax.f32 %v443_v18, 0.0  ;;  %v444_v52 = vmax.f32 %v436_v42, 0.0  ;;  %v448_v25 = vmax.f32 %v440_v5, 0.0 }
  0xfd   :  { %v445_v55 = vmax.f32 %v437_v43, 0.0  ;;  %v449_v12 = vmax.f32 %v441_v49, 0.0  ;;  %v446_v61 = vmax.f32 %v438_v44, 0.0  ;;  %v450_v53 = vmax.f32 %v442_v51, 0.0 }
  0xfe   :  { %v1582_v31 = vpack.c.bf16 %v451_v47, %v447_v46  ;;  %v1573_v54 = vpack.c.bf16 %v448_v25, %v444_v52  ;;  %v1749_v46 = vld [vmem:[#allocation8 + $0x38] sm:$0xff] }
  0xff   :  { %v1576_v19 = vpack.c.bf16 %v449_v12, %v445_v55  ;;  %v1579_v56 = vpack.c.bf16 %v450_v53, %v446_v61  ;;  %v1757_v47 = vld [vmem:[#allocation8 + $0x78] sm:$0xff]  ;;  %v1748_v61 = vld [vmem:[#allocation8 + $0x30] sm:$0xff] }
 0x100   :  { %1574 = vmatmul.msk.bf16.vlgmr.msra.gmra.mxu0 %vm2122_vm2, %v1573_v54  ;;  %1583 = vmatmul.msk.bf16.vlgmr.msra.gmra.mxu3 %vm2122_vm2, %v1582_v31  ;;  %v1756_v53 = vld [vmem:[#allocation8 + $0x70] sm:$0xff] }
 0x101   :  { %1577 = vmatmul.msk.bf16.vlgmr.msra.gmra.mxu1 %vm2122_vm2, %v1576_v19  ;;  %1580 = vmatmul.msk.bf16.vlgmr.msra.gmra.mxu2 %vm2122_vm2, %v1579_v56 }
 0x102   :  { %1207 = vmatpush.bf16.msra.mxu0 %v1749_v46  ;;  %1221 = vmatpush.bf16.msra.mxu1 %v1757_v47  ;;  %v1596_v46 = vld [vmem:[%s2198_s6 + $0x1] ss:$2 sm:$0x3] }
 0x106   :  { %1208 = vmatpush.bf16.msra.mxu0 %v1748_v61  ;;  %1222 = vmatpush.bf16.msra.mxu1 %v1756_v53 }
 0x110   :  { %1586 = vmatmul.msk.bf16.vlgmr.msrb.gmra.mxu0 %vm2122_vm2, %v1573_v54  ;;  %1595 = vmatmul.msk.bf16.vlgmr.msrb.gmra.mxu3 %vm2122_vm2, %v1582_v31 }
 0x111   :  { %1589 = vmatmul.msk.bf16.vlgmr.msrb.gmra.mxu1 %vm2122_vm2, %v1576_v19  ;;  %1592 = vmatmul.msk.bf16.vlgmr.msrb.gmra.mxu2 %vm2122_vm2, %v1579_v56 }
 0x17d   :  { %v867_v57 = vpop.f32.mrf.mxu0 }
 0x17e   :  { %v881_v59 = vpop.f32.mrf.mxu1 }
 0x17f   :  { %v882_v22 = vadd.f32 %v881_v59, %v867_v57  ;;  %v1747_v59 = vld [vmem:[#allocation8 + $0x28] sm:$0xff] }
 0x180   :  { %1209 = vmatpush.bf16.msra.mxu0 %v1747_v59 }
 0x183   :  { %v909_v60 = vpop.f32.mrf.mxu3 }
 0x184   :  { %v895_v62 = vpop.f32.mrf.mxu2 }
 0x185   :  { %v869_v63 = vpop.f32.mrf.mxu0  ;;  %v896_v1 = vadd.f32 %v895_v62, %v882_v22 }
 0x186   :  { %v883_v0 = vpop.f32.mrf.mxu1 }
 0x187   :  { %v884_v2 = vadd.f32 %v883_v0, %v869_v63  ;;  %v2142_v7 = vadd.f32 %v909_v60, %v896_v1  ;;  %v1755_v60 = vld [vmem:[#allocation8 + $0x68] sm:$0xff] }
 0x188   :  { %1223 = vmatpush.bf16.msra.mxu1 %v1755_v60 }
 0x189   :  { %v986_v14 = vmul.f32 %v2142_v7, %v2142_v7 }
 0x18b   :  { %v911_v4 = vpop.f32.mrf.mxu3 }
 0x18c   :  { %v897_v6 = vpop.f32.mrf.mxu2 }
 0x18d   :  { %v898_v8 = vadd.f32 %v897_v6, %v884_v2  ;;  %v923_v10 = vpop.f32.mrf.mxu0  ;;  %v1746_v2 = vld [vmem:[#allocation8 + $0x20] sm:$0xff] }
 0x18e   :  { %v937_v11 = vpop.f32.mrf.mxu1  ;;  %1210 = vmatpush.bf16.msra.mxu0 %v1746_v2 }
 0x18f   :  { %v2144_v13 = vadd.f32 %v911_v4, %v898_v8  ;;  %v938_v23 = vadd.f32 %v937_v11, %v923_v10  ;;  %v1754_v4 = vld [vmem:[#allocation8 + $0x60] sm:$0xff] }
 0x190   :  { %1224 = vmatpush.bf16.msra.mxu1 %v1754_v4 }
 0x191   :  { %v970_v15 = vadd.f32 %v2144_v13, %v2142_v7  ;;  %v988_v16 = vmul.f32 %v2144_v13, %v2144_v13 }
 0x193   :  { %v971_v17 = vrot.slane %v970_v15, 4  ;;  %v990_v20 = vadd.f32 %v988_v16, %v986_v14  ;;  %v965_v58 = vpop.f32.mrf.mxu3  ;;  %v1745_v14 = vld [vmem:[#allocation8 + $0x18] sm:$0xff] }
 0x194   :  { %v951_v21 = vpop.f32.mrf.mxu2  ;;  %1211 = vmatpush.bf16.msra.mxu0 %v1745_v14 }
 0x195   :  { %v972_v26 = vadd.f32 %v971_v17, %v970_v15  ;;  %v991_v33 = vrot.slane %v990_v20, 4  ;;  %v952_v27 = vadd.f32 %v951_v21, %v938_v23  ;;  %v925_v40 = vpop.f32.mrf.mxu0  ;;  %v1753_v15 = vld [vmem:[#allocation8 + $0x58] sm:$0xff]  ;;  %v1744_v21 = vld [vmem:[#allocation8 + $0x10] sm:$0xff]  ;;  %v1743_v23 = vld [vmem:[#allocation8 + $0x8] sm:$0xff] }
 0x196   :  { %v939_v3 = vpop.f32.mrf.mxu1  ;;  %1225 = vmatpush.bf16.msra.mxu1 %v1753_v15 }
 0x197   :  { %v973_v48 = vrot.slane %v972_v26, 2  ;;  %v992_v24 = vadd.f32 %v991_v33, %v990_v20  ;;  %v940_v9 = vadd.f32 %v939_v3, %v925_v40  ;;  %v2152_v35 = vadd.f32 %v965_v58, %v952_v27  ;;  %v1752_v58 = vld [vmem:[#allocation8 + $0x50] sm:$0xff]  ;;  %v1750_v27 = vld [vmem:[#allocation8 + $0x40] sm:$0xff] }
 0x198   :  { %1212 = vmatpush.bf16.msra.mxu0 %v1744_v21 }
 0x199   :  { %v974_v28 = vadd.f32 %v973_v48, %v972_v26  ;;  %v993_v29 = vrot.slane %v992_v24, 2  ;;  %v987_v5 = vmul.f32 %v2152_v35, %v2152_v35  ;;  %v1751_v48 = vld [vmem:[#allocation8 + $0x48] sm:$0xff] }
 0x19a   :  { %1226 = vmatpush.bf16.msra.mxu1 %v1752_v58 }
 0x19b   :  { %v975_v30 = vrot.slane %v974_v28, 1  ;;  %v994_v34 = vadd.f32 %v993_v29, %v992_v24  ;;  %v967_v39 = vpop.f32.mrf.mxu3 }
 0x19c   :  { %v953_v36 = vpop.f32.mrf.mxu2  ;;  %1213 = vmatpush.bf16.msra.mxu0 %v1743_v23 }
 0x19d   :  { %v976_v45 = vadd.f32 %v975_v30, %v974_v28  ;;  %v995_v37 = vrot.slane %v994_v34, 1  ;;  %v954_v38 = vadd.f32 %v953_v36, %v940_v9 }
 0x19e   :  { %1227 = vmatpush.bf16.msra.mxu1 %v1751_v48 }
 0x19f   :  { %v2155_v41 = vmul.f32 %v976_v45, %v1958_v32  ;;  %v996_v18 = vadd.f32 %v995_v37, %v994_v34  ;;  %v2157_v42 = vadd.f32 %v967_v39, %v954_v38  ;;  %v1012_v38 = vld [vmem:[%s2198_s6] ss:$2 sm:$0x3] }
 0x1a1   :  { %v1004_v43 = vmul.f32 %v996_v18, %v1958_v32  ;;  %v1006_v49 = vmul.f32 %v2155_v41, %v2155_v41  ;;  %v977_v44 = vadd.f32 %v2157_v42, %v2152_v35  ;;  %v989_v51 = vmul.f32 %v2157_v42, %v2157_v42 }
 0x1a2   :  { %1228 = vmatpush.bf16.msra.mxu1 %v1750_v27 }
 0x1a3   :  { %v1008_v52 = vsub.f32 %v1004_v43, %v1006_v49  ;;  %v978_v25 = vrot.slane %v977_v44, 4  ;;  %v997_v50 = vadd.f32 %v989_v51, %v987_v5 }
 0x1a5   :  { %v979_v55 = vadd.f32 %v978_v25, %v977_v44  ;;  %v998_v12 = vrot.slane %v997_v50, 4  ;;  %v1010_v31 = vmax.f32 %v1008_v52, 0.0 }
 0x1a7   :  { %v980_v54 = vrot.slane %v979_v55, 2  ;;  %v999_v19 = vadd.f32 %v998_v12, %v997_v50  ;;  %v1013_v62 = vadd.f32 1e-05, %v1010_v31 }
 0x1a9   :  { %v981_v56 = vadd.f32 %v980_v54, %v979_v55  ;;  %v1000_v57 = vrot.slane %v999_v19, 2  ;;  %1776 = vrsqrt.f32 %v1013_v62  ;;  %vm1021_vm8 = vweird.f32 %v1013_v62 }
 0x1ab   :  { %v982_v63 = vrot.slane %v981_v56, 1  ;;  %v1001_v0 = vadd.f32 %v1000_v57, %v999_v19 }
 0x1ad   :  { %v983_v22 = vadd.f32 %v982_v63, %v981_v56  ;;  %v1002_v1 = vrot.slane %v1001_v0, 1 }
 0x1af   :  { %v985_v6 = vmul.f32 %v983_v22, %v1958_v32  ;;  %v1003_v8 = vadd.f32 %v1002_v1, %v1001_v0  ;;  %v1777_v17 = vpop.eup %1776 }
 0x1b0   :  { %v1016_v33 = vmul.f32 %v1777_v17, %v1013_v62  ;;  %vm1022_vm4 = vweird.f32 %v1777_v17 }
 0x1b1   :  { %v1005_v10 = vmul.f32 %v1003_v8, %v1958_v32  ;;  %v1007_v11 = vmul.f32 %v985_v6, %v985_v6  ;;  %v1742_v32 = vld [vmem:[#allocation8] sm:$0xff]  ;;  %vm1023_vm9 = vmor %vm1021_vm8, %vm1022_vm4 }
 0x1b2   :  { %v1017_v24 = vmul.f32 %v1777_v17, %v1016_v33  ;;  %1214 = vmatpush.bf16.msra.mxu0 %v1742_v32 }
 0x1b3   :  { %v1009_v16 = vsub.f32 %v1005_v10, %v1007_v11 }
 0x1b4   :  { %v1018_v3 = vmul.f32 0.5, %v1017_v24 }
 0x1b5   :  { %v1011_v20 = vmax.f32 %v1009_v16, 0.0 }
 0x1b6   :  { %v1019_v30 = vsub.f32 1.5, %v1018_v3 }
 0x1b7   :  { %v1014_v26 = vadd.f32 1e-05, %v1011_v20 }
 0x1b8   :  { %v1020_v36 = vmul.f32 %v1777_v17, %v1019_v30 }
 0x1b9   :  { %1778 = vrsqrt.f32 %v1014_v26  ;;  %vm1031_vm6 = vweird.f32 %v1014_v26 }
 0x1ba   :  { %v1024_v18 = vsel %vm1023_vm9, %v1777_v17, %v1020_v36 }
 0x1bf   :  { %v1779_v40 = vpop.eup %1778 }
 0x1c0   :  { %v1026_v28 = vmul.f32 %v1779_v40, %v1014_v26  ;;  %vm1032_vm3 = vweird.f32 %v1779_v40 }
 0x1c1   :  { %vm1033_vm7 = vmor %vm1031_vm6, %vm1032_vm3 }
 0x1c2   :  { %v1027_v29 = vmul.f32 %v1779_v40, %v1026_v28 }
 0x1c4   :  { %v1028_v34 = vmul.f32 0.5, %v1027_v29 }
 0x1c6   :  { %v1029_v9 = vsub.f32 1.5, %v1028_v34 }
 0x1c8   :  { %v1030_v45 = vmul.f32 %v1779_v40, %v1029_v9 }
 0x1ca   :  { %v1034_v37 = vsel %vm1033_vm7, %v1779_v40, %v1030_v45 }
 0x1cb   :  { %v1037_v39 = vrot.slane %v1034_v37, 7 }
 0x1cd   :  { %v1038_v5 = vsel %vm384_vm5, %v1024_v18, %v1037_v39 }
 0x1ce   :  { %v1040_v43 = vmul.f32 %v1038_v5, %v1012_v38 }
 0x1d0   :  { %v1044_v49 = vperm.slane %v1040_v43, 0  ;;  %v1045_v44 = vperm.slane %v1040_v43, 1 }
 0x1d2   :  { %v1049_v51 = vmul.f32 %v1045_v44, %v985_v6  ;;  %v1048_v47 = vmul.f32 %v1044_v49, %v2155_v41  ;;  %v1059_v55 = vmul.f32 %v1045_v44, %v2157_v42  ;;  %v1056_v12 = vmul.f32 %v1044_v49, %v2142_v7  ;;  %v1767_v7 = vld [vmem:[%s2200_s8] ss:$0 sm:$0xff] }
 0x1d3   :  { %v1058_v53 = vmul.f32 %v1044_v49, %v2144_v13  ;;  %v1057_v54 = vmul.f32 %v1045_v44, %v2152_v35 }
 0x1d4   :  { %v1052_v52 = vrot.slane %v1049_v51, 7 }
 0x1d6   :  { %v1053_v25 = vsel %vm384_vm5, %v1048_v47, %v1052_v52 }
 0x1d7   :  { %v1055_v50 = vsub.f32 %v1596_v46, %v1053_v25 }
 0x1d9   :  { %v1062_v61 = vperm.slane %v1055_v50, 1  ;;  %v1061_v31 = vperm.slane %v1055_v50, 0 }
 0x1db   :  { %v1068_v19 = vadd.f32 %v1062_v61, %v1059_v55  ;;  %v1065_v56 = vadd.f32 %v1061_v31, %v1056_v12  ;;  %v1067_v57 = vadd.f32 %v1061_v31, %v1058_v53  ;;  %v1066_v59 = vadd.f32 %v1062_v61, %v1057_v54 }
 0x1dd   :  { %v1072_v60 = vmax.f32 %v1068_v19, 0.0  ;;  %v1069_v41 = vmax.f32 %v1065_v56, 0.0  ;;  %v1071_v62 = vmax.f32 %v1067_v57, 0.0  ;;  %v1070_v63 = vmax.f32 %v1066_v59, 0.0 }
 0x1df   :  { %v1073_v0 = vpack.c.bf16 %v1071_v62, %v1069_v41  ;;  %v1074_v22 = vpack.c.bf16 %v1072_v60, %v1070_v63 }
 0x1e1   :  { %1215 = vmatmul.bf16.vlgmr.msra.gmra.mxu0 %v1073_v0  ;;  %1229 = vmatmul.bf16.vlgmr.msra.gmra.mxu1 %v1074_v22 }
 0x25e   :  { %v1216_v13 = vpop.f32.mrf.mxu0  ;;  %v1230_v42 = vpop.f32.mrf.mxu1 }
 0x25f   :  { %v1217_v1 = vadd.f32 %v1767_v7, %v1216_v13 }
 0x261   :  { %v1231_v35 = vadd.f32 %v1230_v42, %v1217_v1 }
 0x263   :  { %1235 = vst [vmem:[%s2201_s9] sm:$0xff] %v1231_v35 }
 0x266   :  { %v1218_v2 = vpop.f32.mrf.mxu0  ;;  %v1232_v6 = vpop.f32.mrf.mxu1 }
 0x267   :  { %v1219_v4 = vadd.f32 %v1767_v7, %v1218_v2 }
 0x269   :  { %v1233_v8 = vadd.f32 %v1232_v6, %v1219_v4 }
 0x26b   :  { %1236 = vst [vmem:[%s2201_s9 + $0x8] sm:$0xff] %v1233_v8 }
 0x26c   :  { %1241 = vsyncpa [#allocation5], 1 }
 0x26d   :  { %1242 = vsyncpa [#allocation7], 1 }

</bundles_post_ra>
